<compile_context>
chip_gen: v7x
topology: tpu7x:2x2x1
jax: 0.10.0
libtpu: 0.0.40
codegen_flags: <defaults>
</compile_context>

<pallas_src>
import functools

import jax
import jax.numpy as jnp
from jax import lax
from jax.experimental import pallas as pl
from jax.experimental.pallas import tpu as pltpu


# ----------------------------------------------------------------------------
# helpers
# ----------------------------------------------------------------------------
def _round_up(x, m):
    return (x + m - 1) // m * m


def _vmem_limit_bytes():
    # ~75% of physical VMEM: 96 MiB on v5e/v6e (128 MiB), 48 MiB on v7x (64 MiB).
    try:
        cap = int(pltpu.get_tpu_info().vmem_capacity_bytes)
    except Exception:
        cap = 64 * 1024 * 1024        # conservative (v7x-sized) fallback
    return max(cap * 3 // 4, 32 * 1024 * 1024)


def _choose_tile_v(V, H, weight_bytes, vmem_limit, *, target=2048):
    # Multiple of 256 (MXU/lane friendly); double-buffered weight tiles must fit
    # the generation-aware VMEM budget (minus headroom for h / noise / scratch).
    budget = max(vmem_limit - 8 * 1024 * 1024, 4 * 1024 * 1024)
    t = min(_round_up(target, 256), _round_up(V, 256))
    while t > 256 and 2 * t * H * weight_bytes > budget:
        t -= 256
    return max(t, 256)


def _merge_splits(max_out, arg_out):
    # (n_split, N, 1) per-TensorCore partials -> (N,) token ids.
    m = max_out[:, :, 0]                                   # (n_split, N)
    a = arg_out[:, :, 0]
    best = jnp.argmax(m, axis=0)                           # (N,)
    return jnp.take_along_axis(a, best[None, :], axis=0)[0]


# ----------------------------------------------------------------------------
# Fast path: fused logits tile (MXU) + Gumbel-max sampling, streamed over vocab
# ----------------------------------------------------------------------------
def _fused_sample_kernel(h_ref, w_ref, g_ref, max_ref, arg_ref, max_sc, arg_sc,
                         *, vocab_size, tile_v, tiles_per_split):
    c = pl.program_id(0)                 # vocab split (parallel, v7x megacore)
    j = pl.program_id(1)                 # vocab tile inside the split

    @pl.when(j == 0)
    def _():
        max_sc[...] = jnp.full_like(max_sc, -jnp.inf)
        arg_sc[...] = jnp.zeros_like(arg_sc)

    # (N, H) @ (H, tile_v) in native bf16, f32 accumulation on the MXU.
    logits = jnp.dot(h_ref[...], w_ref[0], preferred_element_type=jnp.float32)
    col = (c * tiles_per_split + j) * tile_v + lax.broadcasted_iota(
        jnp.int32, logits.shape, 1)
    # Gumbel-max: argmax(logits + g) ~ multinomial(softmax(logits)); padded
    # vocab columns are forced to -inf.
    z = jnp.where(col < vocab_size, logits + g_ref[...], -jnp.inf)

    tile_max = jnp.max(z, axis=-1, keepdims=True)
    cand = jnp.where(z >= tile_max, col, jnp.int32(2 ** 30))
    tile_arg = jnp.min(cand, axis=-1, keepdims=True)

    better = tile_max > max_sc[...]
    arg_sc[...] = jnp.where(better, tile_arg, arg_sc[...])
    max_sc[...] = jnp.where(better, tile_max, max_sc[...])

    @pl.when(j == pl.num_programs(1) - 1)
    def _():
        max_ref[0] = max_sc[...]
        arg_ref[0] = arg_sc[...]


def fused_logits_sample(h, w_tiles, gumbel, vocab_size, *, tile_v, n_split,
                        vmem_limit):
    N, H = h.shape
    num_tiles = w_tiles.shape[0]
    tps = num_tiles // n_split
    kernel = functools.partial(_fused_sample_kernel, vocab_size=vocab_size,
                               tile_v=tile_v, tiles_per_split=tps)
    return pl.pallas_call(
        kernel,
        out_shape=(jax.ShapeDtypeStruct((n_split, N, 1), jnp.float32),
                   jax.ShapeDtypeStruct((n_split, N, 1), jnp.int32)),
        grid_spec=pltpu.PrefetchScalarGridSpec(
            num_scalar_prefetch=0,
            grid=(n_split, tps),
            in_specs=[
                pl.BlockSpec((N, H), lambda c, j: (0, 0)),
                pl.BlockSpec((1, H, tile_v), lambda c, j: (c * tps + j, 0, 0)),
                pl.BlockSpec((N, tile_v), lambda c, j: (0, c * tps + j)),
            ],
            out_specs=[
                pl.BlockSpec((1, N, 1), lambda c, j: (c, 0, 0)),
                pl.BlockSpec((1, N, 1), lambda c, j: (c, 0, 0)),
            ],
            scratch_shapes=[pltpu.VMEM((N, 1), jnp.float32),
                            pltpu.VMEM((N, 1), jnp.int32)],
        ),
        compiler_params=pltpu.CompilerParams(
            dimension_semantics=("parallel", "arbitrary"),
            vmem_limit_bytes=int(vmem_limit)),
    )(h, w_tiles, gumbel)


# ----------------------------------------------------------------------------
# Top-p (cold) path kernel 1: tiled logits, bf16 writeback
# ----------------------------------------------------------------------------
def _logits_kernel(h_ref, w_ref, o_ref, *, vocab_size, tile_v):
    j = pl.program_id(0)
    logits = jnp.dot(h_ref[...], w_ref[0], preferred_element_type=jnp.float32)
    col = j * tile_v + lax.broadcasted_iota(jnp.int32, logits.shape, 1)
    o_ref[...] = jnp.where(col < vocab_size, logits, -jnp.inf).astype(o_ref.dtype)


def compute_logits(h, w_tiles, vocab_size, *, tile_v, vmem_limit,
                   out_dtype=jnp.bfloat16):
    N, H = h.shape
    num_tiles = w_tiles.shape[0]
    kernel = functools.partial(_logits_kernel, vocab_size=vocab_size,
                               tile_v=tile_v)
    return pl.pallas_call(
        kernel,
        out_shape=jax.ShapeDtypeStruct((N, num_tiles * tile_v), out_dtype),
        grid_spec=pltpu.PrefetchScalarGridSpec(
            num_scalar_prefetch=0,
            grid=(num_tiles,),
            in_specs=[
                pl.BlockSpec((N, H), lambda j: (0, 0)),
                pl.BlockSpec((1, H, tile_v), lambda j: (j, 0, 0)),
            ],
            out_specs=pl.BlockSpec((N, tile_v), lambda j: (0, j)),
        ),
        compiler_params=pltpu.CompilerParams(
            dimension_semantics=("parallel",),
            vmem_limit_bytes=int(vmem_limit)),
    )(h, w_tiles)


# ----------------------------------------------------------------------------
# Top-p (cold) path kernel 2: in-kernel threshold mask + Gumbel-max sampling
# ----------------------------------------------------------------------------
def _masked_sample_kernel(logits_ref, thr_ref, g_ref, max_ref, arg_ref,
                          max_sc, arg_sc, *, vocab_size, tile_v, tiles_per_split):
    c = pl.program_id(0)
    j = pl.program_id(1)

    @pl.when(j == 0)
    def _():
        max_sc[...] = jnp.full_like(max_sc, -jnp.inf)
        arg_sc[...] = jnp.zeros_like(arg_sc)

    lg = logits_ref[...].astype(jnp.float32)
    lg = jnp.where(lg >= thr_ref[...], lg, -jnp.inf)       # top-p mask per row
    col = (c * tiles_per_split + j) * tile_v + lax.broadcasted_iota(
        jnp.int32, lg.shape, 1)
    z = jnp.where(col < vocab_size, lg + g_ref[...], -jnp.inf)

    tile_max = jnp.max(z, axis=-1, keepdims=True)
    cand = jnp.where(z >= tile_max, col, jnp.int32(2 ** 30))
    tile_arg = jnp.min(cand, axis=-1, keepdims=True)

    better = tile_max > max_sc[...]
    arg_sc[...] = jnp.where(better, tile_arg, arg_sc[...])
    max_sc[...] = jnp.where(better, tile_max, max_sc[...])

    @pl.when(j == pl.num_programs(1) - 1)
    def _():
        max_ref[0] = max_sc[...]
        arg_ref[0] = arg_sc[...]


def sample_from_logits(logits, thr, gumbel, vocab_size, *, tile_v, n_split,
                       vmem_limit):
    N, V_pad = logits.shape
    num_tiles = V_pad // tile_v
    tps = num_tiles // n_split
    kernel = functools.partial(_masked_sample_kernel, vocab_size=vocab_size,
                               tile_v=tile_v, tiles_per_split=tps)
    return pl.pallas_call(
        kernel,
        out_shape=(jax.ShapeDtypeStruct((n_split, N, 1), jnp.float32),
                   jax.ShapeDtypeStruct((n_split, N, 1), jnp.int32)),
        grid_spec=pltpu.PrefetchScalarGridSpec(
            num_scalar_prefetch=0,
            grid=(n_split, tps),
            in_specs=[
                pl.BlockSpec((N, tile_v), lambda c, j: (0, c * tps + j)),
                pl.BlockSpec((N, 1), lambda c, j: (0, 0)),
                pl.BlockSpec((N, tile_v), lambda c, j: (0, c * tps + j)),
            ],
            out_specs=[
                pl.BlockSpec((1, N, 1), lambda c, j: (c, 0, 0)),
                pl.BlockSpec((1, N, 1), lambda c, j: (c, 0, 0)),
            ],
            scratch_shapes=[pltpu.VMEM((N, 1), jnp.float32),
                            pltpu.VMEM((N, 1), jnp.int32)],
        ),
        compiler_params=pltpu.CompilerParams(
            dimension_semantics=("parallel", "arbitrary"),
            vmem_limit_bytes=int(vmem_limit)),
    )(logits, thr, gumbel)


# ----------------------------------------------------------------------------
# Top-p threshold: ONE descending sort -> per-row cutoff logit value
# ----------------------------------------------------------------------------
# TODO(synk): sort/argsort have no Pallas TPU lowering; this one sort stays in XLA.
def topp_threshold(logits_f32, top_ps):
    sorted_desc = -jnp.sort(-logits_f32, axis=-1)          # descending values
    probs = jax.nn.softmax(sorted_desc, axis=-1)
    cum = jnp.cumsum(probs, axis=-1)
    keep = (cum - probs) <= top_ps                         # same rule as torch ref
    # Smallest kept logit value; tokens with logit >= thr survive the filter.
    return jnp.min(jnp.where(keep, sorted_desc, jnp.inf), axis=-1, keepdims=True)


# ----------------------------------------------------------------------------
# Sampler module equivalent
# ----------------------------------------------------------------------------
class Sampler:
    def __init__(self, vocab_size, embd_weight, *, tile_v=2048, n_split=2):
        V, H = embd_weight.shape
        assert V == vocab_size
        self.vocab_size = vocab_size
        wbytes = jnp.dtype(embd_weight.dtype).itemsize
        self.vmem_limit = _vmem_limit_bytes()
        self.tile_v = _choose_tile_v(V, H, wbytes, self.vmem_limit, target=tile_v)
        # Vocab split across TensorCores (v7x megacore); skip when vocab is tiny.
        self.n_split = n_split if pl.cdiv(V, self.tile_v) >= n_split else 1
        self.v_pad = _round_up(V, self.n_split * self.tile_v)
        self.num_tiles = self.v_pad // self.tile_v
        # Pre-transpose once, keep native (bf16) dtype, per-tile-contiguous
        # layout (num_tiles, H, tile_v) -> single contiguous DMA per grid step.
        # TODO(synk): int8 (v5e/v6e) / fp8 (v7x) weight quantization would halve
        # the binding HBM stream; left out pending accuracy validation.
        w_t = embd_weight.T                                  # (H, V)
        if self.v_pad > V:
            w_t = jnp.pad(w_t, ((0, 0), (0, self.v_pad - V)))
        self.w_tiles = jnp.transpose(
            w_t.reshape(H, self.num_tiles, self.tile_v), (1, 0, 2))

    def __call__(self, hidden_states, temperatures, top_ps, key):
        n = hidden_states.shape[0]
        if n == 0:
            # torch returns int64; JAX default is int32 (no x64).
            return jnp.zeros((0,), dtype=jnp.int32)
        assert n == len(temperatures) == len(top_ps)

        h = hidden_states
        # NOTE: these host-side checks need concrete Python lists (as in the
        # original module); they are not jit-traceable.
        if any(float(t) != 1.0 for t in temperatures):
            # Fold 1/T into hidden rows: logits/T == (h/T) @ W^T.  Clamp guards
            # T == 0 ("greedy") against divide-by-zero.
            # TODO(synk): exact greedy for T==0 would need a noise-free per-row path.
            t = jnp.asarray(temperatures, jnp.float32).reshape(n, 1)
            inv_t = 1.0 / jnp.maximum(t, 1e-6)
            h = (h * inv_t).astype(hidden_states.dtype)

        # Gumbel-max sampling == torch.multinomial over softmax(logits).
        # Noise generated once per call (portable; avoids pltpu.prng_* which has
        # no interpret lowering and avoids correlated per-tile seeds).
        gumbel = jax.random.gumbel(key, (n, self.v_pad), dtype=jnp.float32)

        if all(float(p) >= 1.0 for p in top_ps):
            # Fast path: fused logits + sampling; (N, V) logits never hit HBM.
            max_out, arg_out = fused_logits_sample(
                h, self.w_tiles, gumbel, self.vocab_size,
                tile_v=self.tile_v, n_split=self.n_split,
                vmem_limit=self.vmem_limit)
        else:
            logits = compute_logits(h, self.w_tiles, self.vocab_size,
                                    tile_v=self.tile_v,
                                    vmem_limit=self.vmem_limit)  # bf16 (N, V_pad)
            tp = jnp.asarray(top_ps, jnp.float32).reshape(n, 1)
            thr = topp_threshold(logits.astype(jnp.float32), tp)  # (N, 1) cutoff
            max_out, arg_out = sample_from_logits(
                logits, thr, gumbel, self.vocab_size,
                tile_v=self.tile_v, n_split=self.n_split,
                vmem_limit=self.vmem_limit)
        return _merge_splits(max_out, arg_out)


if __name__ == "__main__":
    N, H, V = 4, 128, 1000                       # tokens, hidden, vocab

    key = jax.random.PRNGKey(0)
    k_h, k_w, k_u1, k_u2, k_u3 = jax.random.split(key, 5)
    hidden_states = jax.random.normal(k_h, (N, H),
                                      dtype=jnp.float32).astype(jnp.bfloat16)
    embd_weight = (jax.random.normal(k_w, (V, H), dtype=jnp.float32)
                   * 0.05).astype(jnp.bfloat16)

    # Small tile so the demo exercises multi-tile streaming, the 2-way vocab
    # split (megacore path) and the padded-column masking.
    sampler = Sampler(vocab_size=V, embd_weight=embd_weight, tile_v=256)
    assert sampler.n_split == 2 and sampler.num_tiles == 4

    # 1) tiled logits kernel vs plain JAX reference
    logits_k = compute_logits(hidden_states, sampler.w_tiles, V,
                              tile_v=sampler.tile_v,
                              vmem_limit=sampler.vmem_limit)
    logits_ref = (hidden_states.astype(jnp.float32)
                  @ embd_weight.astype(jnp.float32).T)
    diff = jnp.max(jnp.abs(logits_k[:, :V].astype(jnp.float32) - logits_ref))
    assert float(jax.block_until_ready(diff)) < 5e-2, float(diff)

    # 2) fast path (all top_p == 1): fused Gumbel-max == reference argmax
    ids_fast = jax.block_until_ready(
        sampler(hidden_states, [1.0] * N, [1.0] * N, k_u1))
    g_ref = jax.random.gumbel(k_u1, (N, sampler.v_pad), dtype=jnp.float32)
    z_ref = jnp.pad(logits_ref, ((0, 0), (0, sampler.v_pad - V)),
                    constant_values=-jnp.inf) + g_ref
    assert ids_fast.shape == (N,)
    assert bool(jnp.all(ids_fast == jnp.argmax(z_ref, axis=-1).astype(ids_fast.dtype)))

    # 3) top-p cold path with mixed temperatures (incl. 0.0 greedy guard)
    ids_topp = jax.block_until_ready(
        sampler(hidden_states, [1.0, 0.7, 1.3, 0.0], [1.0, 0.9, 0.8, 1.0], k_u2))
    assert ids_topp.shape == (N,)
    assert bool(jnp.all((ids_topp >= 0) & (ids_topp < V)))

    # 4) tiny top_p keeps only each row's max-prob token -> greedy behavior
    ids_g = jax.block_until_ready(
        sampler(hidden_states, [1.0] * N, [1e-6] * N, k_u3))
    picked = jnp.take_along_axis(logits_k[:, :V], ids_g[:, None], axis=1)[:, 0]
    assert bool(jnp.all(picked == jnp.max(logits_k[:, :V], axis=-1)))

    print("KERNEL_OK")
</pallas_src>

<mosaic_0001>
module attributes {stable_mosaic.version = 11 : i64} {
  func.func @_logits_kernel(%arg0: i32, %arg1: memref<4x128xbf16, #tpu.memory_space<vmem>>, %arg2: memref<1x128x256xbf16, #tpu.memory_space<vmem>>, %arg3: memref<4x256xbf16, #tpu.memory_space<vmem>>) attributes {dimension_semantics = [#tpu.dimension_semantics<parallel>], iteration_bounds = array<i64: 4>, scalar_prefetch = 0 : i64, scratch_operands = 0 : i64, tpu.core_type = #tpu.core_type<tc>, window_params = [{pipeline_mode = #tpu.pipeline_mode<synchronous>, transform_indices = @transform_0, window_bounds = array<i64: 4, 128>}, {transform_indices = @transform_1, window_bounds = array<i64: 1, 128, 256>}, {transform_indices = @transform_2, window_bounds = array<i64: 4, 256>}]} {
    %c0 = arith.constant 0 : index
    %c0_0 = arith.constant 0 : index
    %0 = vector.load %arg1[%c0, %c0_0] : memref<4x128xbf16, #tpu.memory_space<vmem>>, vector<4x128xbf16>
    %c0_1 = arith.constant 0 : index
    %c0_2 = arith.constant 0 : index
    %c0_3 = arith.constant 0 : index
    %1 = vector.load %arg2[%c0_1, %c0_2, %c0_3] : memref<1x128x256xbf16, #tpu.memory_space<vmem>>, vector<1x128x256xbf16>
    %2 = vector.shape_cast %1 : vector<1x128x256xbf16> to vector<128x256xbf16>
    %cst = arith.constant dense<0.000000e+00> : vector<4x256xf32>
    %3 = tpu.matmul %0, %2, %cst {dimension_numbers = #tpu.dot_dimension_numbers<[1], [0], [0], [1], [0, 0, 1, 1], [], []>} : vector<4x128xbf16>, vector<128x256xbf16>, vector<4x256xf32> -> vector<4x256xf32>
    %c256_i32 = arith.constant 256 : i32
    %4 = arith.muli %arg0, %c256_i32 : i32
    %5 = tpu.iota {dimensions = array<i32: 1>} : vector<4x256xi32>
    %6 = vector.broadcast %4 : i32 to vector<4x256xi32>
    %7 = arith.addi %6, %5 : vector<4x256xi32>
    %c1000_i32 = arith.constant 1000 : i32
    %8 = vector.broadcast %c1000_i32 : i32 to vector<4x256xi32>
    %9 = arith.cmpi slt, %7, %8 : vector<4x256xi32>
    %cst_4 = arith.constant 0xFF800000 : f32
    %10 = vector.broadcast %cst_4 : f32 to vector<4x256xf32>
    %11 = arith.select %9, %3, %10 : vector<4x256xi1>, vector<4x256xf32>
    %12 = arith.truncf %11 : vector<4x256xf32> to vector<4x256xbf16>
    %c0_5 = arith.constant 0 : index
    %c0_6 = arith.constant 0 : index
    %13 = vector.load %arg3[%c0_5, %c0_6] : memref<4x256xbf16, #tpu.memory_space<vmem>>, vector<4x256xbf16>
    tpu.vector_store %arg3[%c0_5, %c0_6], %12 {strides = array<i32>} : memref<4x256xbf16, #tpu.memory_space<vmem>>, vector<4x256xbf16>,
    return
  }
  func.func @transform_0(%arg0: i32) -> (i32, i32) {
    %c0_i32 = arith.constant 0 : i32
    %c0_i32_0 = arith.constant 0 : i32
    %c0_i32_1 = arith.constant 0 : i32
    return %c0_i32, %c0_i32_0 : i32, i32
  }
  func.func @transform_1(%arg0: i32) -> (i32, i32, i32) {
    %c0_i32 = arith.constant 0 : i32
    %c0_i32_0 = arith.constant 0 : i32
    %c0_i32_1 = arith.constant 0 : i32
    return %arg0, %c0_i32, %c0_i32_0 : i32, i32, i32
  }
  func.func @transform_2(%arg0: i32) -> (i32, i32) {
    %c0_i32 = arith.constant 0 : i32
    %c0_i32_0 = arith.constant 0 : i32
    return %c0_i32, %arg0 : i32, i32
  }
}

</mosaic_0001>

<bundles_post_ra>
// kernel: tpu_custom_call.1
= control target key start
LH: loop header
LB: loop body
LE: loop exit
PB: predicated region body
PF: predicated region fallthrough
CT: control target
= control target key end

     0   :  { %7 = vsyncpa [#allocation3], 0  ;;  %s923_s0 = inlined_call_operand.hbm [shape: bf16[4,128], index: 0, kind: input, shape index: {}]   ;;  %s924_s1 = inlined_call_operand.hbm [shape: bf16[4,128,256], index: 1, kind: input, shape index: {}]   ;;  %s925_s2 = inlined_call_operand.hbm [shape: bf16[4,1024], index: 2, kind: output, shape index: {}]  }
   0x1   :  { %8 = vsyncpa [#allocation6], 0 }
   0x2   :  { %10 = vsyncpa [#allocation6 + $0x1], 0 }
   0x3   :  { %11 = vsyncpa [#allocation4], 0 }
   0x4   :  { %13 = vsyncpa [#allocation4 + $0x1], 0  ;;  %s709_s9 = smov 0   ;;  %s711_s10 = smov 0  }
   0x5   :  { %s713_s11 = smov 0   ;;  %s715_s12 = smov 0  }
   0x6 LB: > { %s730_s13 = sadd.s32 4294967295, %s686_s12   ;;  %s437_s14 = sadd.s32 4294967294, %s686_s12   ;;  %s686_s12 = sphi %s715_s12, %s948_s12   ;;  %s682_s11 = sphi %s713_s11, %s947_s11   ;;  %s678_s10 = sphi %s711_s10, %s946_s10   ;;  %s674_s9 = sphi %s709_s9, %s945_s9  }
   0x7   : > { %s734_s15 = sadd.s32 1, %s686_s12   ;;  %s47_s16 = sadd.s32 1, %s682_s11 }
   0x8   : > { %s44_s17 = ssub.s32 %s686_s12, %s734_s15  ;;  %p54_p0 = scmp.ne.s32.totalorder %s682_s11, %s678_s10 }
   0x9   : > { %p45_p1 = scmp.eq.s32.totalorder %s44_s17, 0  ;;  %p55_p2 = scmp.eq.s32.totalorder %s686_s12, 0 }
   0xa   : > { %p60_p3 = scmp.ne.s32.totalorder %s678_s10, %s674_s9  ;;  %p926_p4 = scmp.eq.s32.totalorder %s730_s13, 0 }
   0xb   : > { %s746_s18 = scalar_select %p45_p1, %s682_s11, %s47_s16  }
   0xc   : > { %p748_p5 = por %p55_p2, %p54_p0  ;;  %p754_p6 = por %p926_p4, %p60_p3 }
   0xd   : > { %p84_p7 = scmp.eq.s32.totalorder %s730_s13, 3  ;;  %p90_p8 = scmp.eq.s32.totalorder %s437_s14, 3 }
   0xe   : > { %s932_s20 = scalar_select %p754_p6, 1, 0 }
   0xf   : > { %p438_p9 = scmp.ge.s32.totalorder %s686_s12, 1  ;;  %p97_p10 = scmp.lt.s32.totalorder %s686_s12, 5 }
  0x10   : > { %p761_p11 = por %p84_p7, %p54_p0  ;;  %p765_p12 = por %p90_p8, %p60_p3 }
  0x11   : > { %p769_p13 = pnand %p438_p9, %p97_p10  ;;  %s688_s24 = smov [#allocation2]  }
  0x12   : > { %s933_s21 = scalar_select %p761_p11, 1, 0 }
  0x13   : > { %s934_s22 = scalar_select %p765_p12, 1, 0 }
  0x14   : > { %s935_s23 = scalar_select %p769_p13, 1, 0 }
  0x15   : > { %p482_p1 = pneg %p769_p13  ;;  %s110_s25 = sshll.u32 %s688_s24, 4  ;;  %s111_s25 = int_to_ptr.vmem [resolvable:$true] %s110_s25 }
  0x16   : > { %p495_p2 = scmp.lt.s32.totalorder %s686_s12, 4  ;;  %s121_s27 = sand.u32 1, %s682_s11  }
  0x17   : > { %p778_p0 = pnand %p482_p1, %p926_p4  ;;  %s441_s29 = sshll.u32 %s121_s27, 7 }
  0x18   : > { %p785_p3 = pnand %p495_p2, %p748_p5  ;;  %s558_s4 = scalar_lea.hbm %s923_s0, 32 }
  0x19   : > { %p559_p7 = scmp.ne.s32.totalorder %s923_s0, %s558_s4  ;;  %p560_p8 = pneg %p778_p0 }
  0x1a   : > { %s937_s28 = scalar_select %p785_p3, 1, 0 }
  0x1b   : > { %p561_p9 = pnand %p560_p8, %p559_p7  ;;  %p565_p5 = scmp.lt.u32.totalorder %s558_s4, %s923_s0 }
  0x1d   : > { %p562_p10 = pneg %p561_p9 }
  0x1f   : > { %p567_p1 = pnand %p565_p5, %p562_p10 }
  0x21   : > { %570 = shalt.err (!%p567_p1)
}
  0x22   : > { %s571_s14 = scalar_lea.vmem %s111_s25, 32  ;;  %p579_p11 = scmp.lt.s32.totalorder %s111_s25, %s111_s25 }
  0x23   : > { %p572_p2 = scmp.ne.s32.totalorder %s111_s25, %s571_s14  ;;  %p580_p6 = scmp.lt.s32.totalorder %s571_s14, %s571_s14 }
  0x25   : > { %p574_p4 = pnand %p572_p2, %p560_p8  ;;  %p581_p13 = por %p580_p6, %p579_p11 }
  0x27   : > { %p575_p12 = pneg %p574_p4 }
  0x29   : > { %p582_p3 = pnand %p581_p13, %p575_p12 }
  0x2b   : > { %585 = shalt.err (!%p582_p3)
}
  0x2c   : > { %485 = dma.hbm_to_vmem [thread:$0]  (!%p778_p0), %s923_s0, 32, %s111_s25, [#allocation3]  }
  0x2d   : > { %s472_s19 = sshll.u32 %s686_s12, 11  ;;  %s125_s24 = scalar_lea.vmem [#allocation5], %s441_s29 }
  0x2e   : > { %s132_s30 = sshll.u32 %s125_s24, 4  ;;  %s809_s5 = scalar_lea.hbm %s924_s1, %s472_s19  ;;  %s811_s30 = int_to_ptr.vmem [resolvable:$true] %s132_s30 }
  0x2f   : > { %s813_s26 = scalar_lea.sflag [#allocation6], %s121_s27  ;;  %s586_s6 = scalar_lea.hbm %s809_s5, 2048 }
  0x30   : > { %p587_p4 = scmp.ne.s32.totalorder %s809_s5, %s586_s6  ;;  %p938_p6 = scmp.ne.s32.totalorder %s937_s28, 0 }
  0x31   : > { %s591_s7 = scalar_lea.hbm %s924_s1, 8192  ;;  %p592_p0 = scmp.lt.u32.totalorder %s809_s5, %s924_s1 }
  0x32   : > { %p588_p11 = pneg %p938_p6  ;;  %p593_p3 = scmp.lt.u32.totalorder %s591_s7, %s586_s6 }
  0x33   : > { %p595_p8 = scmp.lt.u32.totalorder %s586_s6, %s809_s5 }
  0x34   : > { %p589_p12 = pnand %p588_p11, %p587_p4  ;;  %p594_p7 = por %p593_p3, %p592_p0 }
  0x36   : > { %p590_p13 = pneg %p589_p12  ;;  %p596_p9 = por %p595_p8, %p594_p7 }
  0x38   : > { %p597_p10 = pnand %p596_p9, %p590_p13 }
  0x3a   : > { %600 = shalt.err (!%p597_p10)
}
  0x3b   : > { %s601_s27 = scalar_lea.vmem %s811_s30, 2048  ;;  %s689_s16 = smov [#allocation5]  }
  0x3c   : > { %p602_p5 = scmp.ne.s32.totalorder %s811_s30, %s601_s27  ;;  %s606_s17 = sshll.u32 %s689_s16, 4  ;;  %s607_s17 = int_to_ptr.vmem [resolvable:$false] %s606_s17 }
  0x3d   : > { %s608_s19 = scalar_lea.vmem %s607_s17, 4096  ;;  %p609_p4 = scmp.lt.s32.totalorder %s811_s30, %s607_s17 }
  0x3e   : > { %p604_p1 = pnand %p602_p5, %p588_p11  ;;  %p610_p12 = scmp.lt.s32.totalorder %s608_s19, %s601_s27 }
  0x40   : > { %p605_p2 = pneg %p604_p1  ;;  %p611_p0 = por %p610_p12, %p609_p4 }
  0x42   : > { %p612_p3 = pnand %p611_p0, %p605_p2 }
  0x44   : > { %615 = shalt.err (!%p612_p3)
}
  0x45   : > { %s690_s24 = smov 128   ;;  %s691_s3 = smov 8  }
  0x46   : > { %489 = dma.hbm_to_vmem [thread:$0]  (!%p938_p6), %s809_s5, 2048, %s811_s30, %s813_s26, %s690_s24, %s690_s24, %s691_s3  }
  0x47   : > { %p939_p11 = scmp.ne.s32.totalorder %s935_s23, 0 }
  0x48   : > { %p940_p13 = scmp.eq.s32.totalorder (!%p939_p11), %s730_s13, 0 }
  0x49   : > { %144 = sbr.rel (%p939_p11) target bundleno = 348 (0x15c), region = 28 }
  0x50   : > { %661 = dma.done.wait (%p940_p13), [#allocation3], 32   ;;  %p941_p7 = pmov %p940_p13 }
  0x51   : > { %s848_s4 = sand.u32 1, %s678_s10   ;;  %p942_p6 = scmp.ne.s32.totalorder %s932_s20, 0 }
  0x52   : > { %663 = vsyncadd (%p941_p7), [#allocation3], 4294967264  ;;  %s446_s6 = sshll.u32 %s848_s4, 7  ;;  %s151_s25 = scalar_lea.sflag [#allocation6], %s848_s4 }
  0x53   : > { %s852_s29 = scalar_lea.vmem [#allocation5], %s446_s6 }
  0x54   : > { %665 = dma.done.wait (%p942_p6), %s151_s25, 2048  }
  0x55   : > { %667 = vsyncadd (%p942_p6), %s151_s25, 4294965248  ;;  %v692_v0 = vmov 0   ;;  %v534_v1 = vld [vmem:[%s852_s29 + $0x4] ss:$8 sps:$4 sm:$0xff]   ;;  %v536_v2 = vld [vmem:[%s852_s29] ss:$8 sps:$4 sm:$0xff]   ;;  %v316_v18 = vlaneseq }
  0x56   : > { %306 = vmatprep.mubr.bf16.mxu0 %v692_v0  ;;  %274 = vmatprep.subr.bf16.mxu0 %v534_v1  ;;  %v537_v3 = vld [vmem:[%s852_s29 + $0x14] ss:$8 sps:$4 sm:$0xff]   ;;  %v539_v4 = vld [vmem:[%s852_s29 + $0x10] ss:$8 sps:$4 sm:$0xff]   ;;  %v540_v5 = vld [vmem:[%s852_s29 + $0x24] ss:$8 sps:$4 sm:$0xff]  }
  0x57   : > { %275 = vmatpush1.bf16.msra.mxu0 %v536_v2  ;;  %v542_v6 = vld [vmem:[%s852_s29 + $0x20] ss:$8 sps:$4 sm:$0xff]   ;;  %v543_v7 = vld [vmem:[%s852_s29 + $0x34] ss:$8 sps:$4 sm:$0xff]   ;;  %v545_v8 = vld [vmem:[%s852_s29 + $0x30] ss:$8 sps:$4 sm:$0xff]  }
  0x58   : > { %276 = vmatprep.subr.bf16.mxu0 %v537_v3  ;;  %v546_v9 = vld [vmem:[%s852_s29 + $0x44] ss:$8 sps:$4 sm:$0xff]   ;;  %v548_v10 = vld [vmem:[%s852_s29 + $0x40] ss:$8 sps:$4 sm:$0xff]   ;;  %v549_v11 = vld [vmem:[%s852_s29 + $0x54] ss:$8 sps:$4 sm:$0xff]  }
  0x59   : > { %v551_v12 = vld [vmem:[%s852_s29 + $0x50] ss:$8 sps:$4 sm:$0xff]   ;;  %v552_v13 = vld [vmem:[%s852_s29 + $0x64] ss:$8 sps:$4 sm:$0xff]   ;;  %v554_v14 = vld [vmem:[%s852_s29 + $0x60] ss:$8 sps:$4 sm:$0xff]  }
  0x5a   : > { %v555_v15 = vld [vmem:[%s852_s29 + $0x74] ss:$8 sps:$4 sm:$0xff]   ;;  %v557_v16 = vld [vmem:[%s852_s29 + $0x70] ss:$8 sps:$4 sm:$0xff]   ;;  %v317_v19 = vand.u32 127, %v316_v18  ;;  %s464_s20 = sshll.u32 %s730_s13, 8 }
  0x5b   : > { %277 = vmatpush1.bf16.msra.mxu0 %v539_v4  ;;  %v177_v17 = vld [vmem:[#allocation2] sm:$0x3]  ;;  %v319_v20 = vstv %s464_s20  ;;  %s447_s23 = sshll.u32 %s848_s4, 2  ;;  %s473_s28 = sshll.u32 %s730_s13, 6 }
  0x5c   : > { %278 = vmatprep.subr.bf16.mxu0 %v540_v5  ;;  %v318_v21 = vadd.s32 128, %v317_v19  ;;  %v320_v22 = vadd.s32 %v319_v20, %v317_v19  ;;  %s174_s30 = scalar_lea.vmem [#allocation7], %s447_s23  ;;  %s880_s8 = scalar_lea.hbm %s925_s2, %s473_s28 }
  0x5d   : > { %s355_s5 = sshll.u32 %s174_s30, 4  ;;  %s341_s13 = scalar_lea.sflag [#allocation4], %s848_s4  ;;  %s882_s5 = int_to_ptr.vmem [resolvable:$true] %s355_s5 }
  0x5e   : > { %v321_v23 = vadd.s32 %v319_v20, %v318_v21  ;;  %vm322_vm0 = vcmp.lt.s32.totalorder %v320_v22, 1000  ;;  %s616_s14 = scalar_lea.vmem %s882_s5, 64  ;;  %p943_p9 = scmp.ne.s32.totalorder %s933_s21, 0 }
  0x5f   : > { %279 = vmatpush1.bf16.msra.mxu0 %v542_v6  ;;  %p617_p8 = scmp.ne.s32.totalorder %s882_s5, %s616_s14  ;;  %s693_s27 = smov [#allocation7]  }
  0x60   : > { %280 = vmatprep.subr.bf16.mxu0 %v543_v7  ;;  %vm323_vm1 = vcmp.lt.s32.totalorder %v321_v23, 1000  ;;  %s620_s16 = sshll.u32 %s693_s27, 4  ;;  %s621_s16 = int_to_ptr.vmem [resolvable:$false] %s620_s16 }
  0x61   : > { %p618_p10 = pnand %p617_p8, %p943_p9  ;;  %s622_s17 = scalar_lea.vmem %s621_s16, 128 }
  0x62   : > { %p623_p1 = scmp.lt.s32.totalorder %s882_s5, %s621_s16  ;;  %p624_p2 = scmp.lt.s32.totalorder %s622_s17, %s616_s14 }
  0x63   : > { %281 = vmatpush1.bf16.msra.mxu0 %v545_v8  ;;  %p619_p5 = pneg %p618_p10 }
  0x64   : > { %282 = vmatprep.subr.bf16.mxu0 %v546_v9  ;;  %p625_p4 = por %p624_p2, %p623_p1 }
  0x66   : > { %p626_p12 = pnand %p625_p4, %p619_p5 }
  0x67   : > { %283 = vmatpush1.bf16.msra.mxu0 %v548_v10 }
  0x68   : > { %284 = vmatprep.subr.bf16.mxu0 %v549_v11 }
  0x6b   : > { %285 = vmatpush1.bf16.msra.mxu0 %v551_v12 }
  0x6c   : > { %286 = vmatprep.subr.bf16.mxu0 %v552_v13 }
  0x6f   : > { %287 = vmatpush1.bf16.msra.mxu0 %v554_v14 }
  0x70   : > { %288 = vmatprep.subr.bf16.mxu0 %v555_v15 }
  0x73   : > { %289 = vmatpush1.bf16.msra.mxu0 %v557_v16 }
  0x76   : > { %307 = vmatmul.mubr.bf16.vlgmr.msra.gmra.mrb[0].mxu0 %v177_v17 }
 0x149   : > { %v308_v24 = vpop.f32.mrb[0].mxu0 }
 0x14a   : > { %v324_v25 = vsel %vm322_vm0, %v308_v24, -inf  ;;  %v310_v26 = vpop.f32.mrb[1].mxu0 }
 0x14b   : > { %v325_v27 = vsel %vm323_vm1, %v310_v26, -inf  ;;  %v312_v28 = vpop.f32.mrb[2].mxu0 }
 0x14c   : > { %v465_v29 = vpack.c.bf16 %v325_v27, %v324_v25  ;;  %v313_v30 = vpop.f32.mrb[3].mxu0 }
 0x14e   : > { %466 = vst.sshfl [vmem:[%s174_s30] sm:$0x33 pattern:$0x76325410] %v465_v29 }
 0x14f   : > { %629 = shalt.err (!%p626_p12)
}
 0x150   : > { %s630_s19 = scalar_lea.hbm %s880_s8, 64  ;;  %s634_s4 = scalar_lea.hbm %s925_s2, 256 }
 0x151   : > { %p631_p0 = scmp.ne.s32.totalorder %s880_s8, %s630_s19  ;;  %p635_p13 = scmp.lt.u32.totalorder %s880_s8, %s925_s2 }
 0x152   : > { %p636_p7 = scmp.lt.u32.totalorder %s634_s4, %s630_s19  ;;  %p638_p8 = scmp.lt.u32.totalorder %s630_s19, %s880_s8 }
 0x153   : > { %p632_p3 = pnand %p631_p0, %p943_p9 }
 0x154   : > { %p637_p6 = por %p636_p7, %p635_p13 }
 0x155   : > { %p633_p11 = pneg %p632_p3 }
 0x156   : > { %p639_p10 = por %p638_p8, %p637_p6 }
 0x158   : > { %p640_p5 = pnand %p639_p10, %p633_p11 }
 0x15a   : > { %643 = shalt.err (!%p640_p5)
}
 0x15b   : > { %480 = dma.vmem_to_hbm [thread:$0]  (%p943_p9), %s882_s5, 64, %s880_s8, %s341_s13  }
 0x15c PF: > { %p497_p1 = scmp.ge.s32.totalorder %s686_s12, 2  ;;  %s367_s29 = sand.u32 1, %s674_s9  }
 0x15d   : > { %p944_p2 = scmp.ne.s32.totalorder %s934_s22, 0  ;;  %s368_s20 = scalar_lea.sflag [#allocation4], %s367_s29 }
 0x15f   : > { %p491_p4 = pnand %p497_p1, %p944_p2 }
 0x161   : > { %669 = dma.done.wait (!%p491_p4), %s368_s20, 64  }
 0x162   : > { %671 = vsyncadd (!%p491_p4), %s368_s20, 4294967232  ;;  %p16_p12 = scmp.ge.s32.totalorder %s734_s15, 6   ;;  %s945_s9 = smov %s678_s10 }
 0x163   : > { %s946_s10 = smov %s682_s11  ;;  %s947_s11 = smov %s746_s18 }
 0x164   : > { %s948_s12 = smov %s734_s15  ;;  %18 = sbr.rel (!%p16_p12) target bundleno = 6 (0x6), region = 78 }
 0x16b   :  { %373 = vsyncpa [#allocation3], 1 }
 0x16c   :  { %375 = vsyncpa [#allocation3 + $0x1], 1 }
 0x16d   :  { %376 = vsyncpa [#allocation6], 1 }
 0x16e   :  { %378 = vsyncpa [#allocation6 + $0x1], 1 }
 0x16f   :  { %379 = vsyncpa [#allocation4], 1 }
 0x170   :  { %381 = vsyncpa [#allocation4 + $0x1], 1 }

</bundles_post_ra>
